<compile_context>
chip_gen: v5e
topology: v5e:2x2
jax: 0.10.0
libtpu: 0.0.40
codegen_flags: <defaults>
</compile_context>

<pallas_src>
import functools

import jax
import jax.numpy as jnp
from jax import lax
from jax.experimental import pallas as pl
from jax.experimental.pallas import tpu as pltpu

LANE = 128
BLOCK_ROWS = 4096                       # (4096, 128) f32 block = 2 MiB
_SMALL_LIMIT_BYTES = 4 * 1024 * 1024    # fused gridless path if all 4 fit


# ---------------------------------------------------------------------------
# Fused small-input path: one gridless call, four whole-array VMEM inputs,
# four sums-of-squares written to a (4,) SMEM output.
# ---------------------------------------------------------------------------
def _fused_ssq_kernel(x0_ref, x1_ref, x2_ref, x3_ref, o_ref):
    for i, ref in enumerate((x0_ref, x1_ref, x2_ref, x3_ref)):
        x = ref[...].astype(jnp.float32)   # accumulate in f32 (no wrapper upcast)
        o_ref[i] = jnp.sum(x * x)


def _as_2d(x):
    """Lane-friendly 2-D view of a tensor (no padding, no extra HBM copy)."""
    n = int(x.size)
    if n % LANE == 0:
        return x.reshape(n // LANE, LANE)
    return x.reshape(1, n)


def _fused_sum_of_squares(features):
    views = [_as_2d(f) for f in features]
    total_n = sum(int(f.size) for f in features)
    total_bytes = sum(int(f.size) * f.dtype.itemsize for f in features)
    return pl.pallas_call(
        _fused_ssq_kernel,
        out_shape=jax.ShapeDtypeStruct((4,), jnp.float32),
        in_specs=[pl.BlockSpec(memory_space=pltpu.MemorySpace.VMEM)] * 4,
        out_specs=pl.BlockSpec(memory_space=pltpu.MemorySpace.SMEM),
        cost_estimate=pl.CostEstimate(
            flops=2 * total_n, transcendentals=0,
            bytes_accessed=total_bytes + 4 * 4),
    )(*views)


# ---------------------------------------------------------------------------
# Gridded large-tensor path: big blocks, in-kernel tail masking, (8,128) VMEM
# accumulator with a single cross-lane reduce in a last-step epilogue.
# ---------------------------------------------------------------------------
def _ssq_grid_kernel(x_ref, o_ref, acc_ref, *, valid_rows, block_rows):
    i = pl.program_id(0)

    @pl.when(i == 0)
    def _init():
        acc_ref[...] = jnp.zeros_like(acc_ref)

    x = x_ref[...].astype(jnp.float32)
    if valid_rows % block_rows != 0:
        # Last block is partially out-of-bounds: zero the garbage rows.
        row_ids = block_rows * i + lax.broadcasted_iota(jnp.int32, x.shape, 0)
        x = jnp.where(row_ids < valid_rows, x, 0.0)
    xsq = x * x
    # VPU-only partial reduction into the (8, LANE) accumulator.
    acc_ref[...] += jnp.sum(xsq.reshape(block_rows // 8, 8, LANE), axis=0)

    @pl.when(i == pl.num_programs(0) - 1)
    def _finalize():
        o_ref[0] = jnp.sum(acc_ref[...])


def _sum_of_squares_large(x):
    flat = x.reshape(-1)
    n = int(flat.shape[0])
    body_rows = n // LANE
    body_n = body_rows * LANE

    ssq = jnp.float32(0.0)
    if body_rows > 0:
        block_rows = min(BLOCK_ROWS, pl.cdiv(body_rows, 8) * 8)
        body = flat[:body_n].reshape(body_rows, LANE)
        out = pl.pallas_call(
            functools.partial(_ssq_grid_kernel,
                              valid_rows=body_rows, block_rows=block_rows),
            out_shape=jax.ShapeDtypeStruct((1,), jnp.float32),
            grid_spec=pltpu.PrefetchScalarGridSpec(
                num_scalar_prefetch=0,
                grid=(pl.cdiv(body_rows, block_rows),),
                in_specs=[pl.BlockSpec((block_rows, LANE), lambda i: (i, 0))],
                out_specs=pl.BlockSpec(memory_space=pltpu.MemorySpace.SMEM),
                scratch_shapes=[pltpu.VMEM((8, LANE), jnp.float32)],
            ),
            compiler_params=pltpu.CompilerParams(
                dimension_semantics=("arbitrary",)),
            cost_estimate=pl.CostEstimate(
                flops=2 * body_n, transcendentals=0,
                bytes_accessed=body_n * flat.dtype.itemsize + 4),
        )(body)
        ssq = ssq + out[0]
    if body_n < n:
        # Sub-lane tail (< 128 elements): plain-JAX sum is cheaper than a DMA.
        tail = flat[body_n:].astype(jnp.float32)
        ssq = ssq + jnp.sum(tail * tail)
    return ssq


# ---------------------------------------------------------------------------
# Public API: JAX/Pallas equivalent of NormalizedCompactnessNormLoss.forward.
# ---------------------------------------------------------------------------
def normalized_compactness_norm_loss(features_tuple):
    assert isinstance(features_tuple, tuple) and len(features_tuple) == 4, (
        "Input must be a tuple of four tensors.")
    total_bytes = sum(int(f.size) * f.dtype.itemsize for f in features_tuple)
    if total_bytes <= _SMALL_LIMIT_BYTES:
        ssqs = _fused_sum_of_squares(features_tuple)              # (4,) f32
    else:
        ssqs = jnp.stack([_sum_of_squares_large(f) for f in features_tuple])
    numels = jnp.asarray([float(f.size) for f in features_tuple], jnp.float32)
    return jnp.mean(jnp.sqrt(ssqs) / numels)


if __name__ == "__main__":
    key = jax.random.PRNGKey(0)
    k1, k2, k3, k4, k5 = jax.random.split(key, 5)

    # Four feature maps (NCHW), small shapes -> fused gridless path.
    features = (
        jax.random.normal(k1, (2, 4, 16, 16), dtype=jnp.float32),
        jax.random.normal(k2, (2, 8, 8, 8), dtype=jnp.float32),
        jax.random.normal(k3, (2, 16, 4, 4), dtype=jnp.float32),
        jax.random.normal(k4, (2, 32, 2, 2), dtype=jnp.float32),
    )
    loss = jax.block_until_ready(normalized_compactness_norm_loss(features))

    # Pure-JAX reference check (same math, no Pallas).
    ref = jnp.mean(jnp.stack(
        [jnp.linalg.norm(f.reshape(-1)) / f.size for f in features]))
    assert jnp.allclose(loss, ref, rtol=1e-5, atol=1e-7), (loss, ref)

    # Also exercise the gridded large-tensor path: non-multiple-of-128 length
    # (tail handling) and a partial last block (in-kernel row masking).
    big = jax.random.normal(k5, (BLOCK_ROWS * LANE + 5000,), dtype=jnp.float32)
    got = jax.block_until_ready(_sum_of_squares_large(big))
    want = jnp.sum(big.astype(jnp.float32) ** 2)
    assert jnp.allclose(got, want, rtol=1e-4), (got, want)

    print("KERNEL_OK")
</pallas_src>

<mosaic_0001>
module attributes {stable_mosaic.version = 11 : i64} {
  func.func @_fused_ssq_kernel(%arg0: memref<16x128xf32, #tpu.memory_space<vmem>>, %arg1: memref<8x128xf32, #tpu.memory_space<vmem>>, %arg2: memref<4x128xf32, #tpu.memory_space<vmem>>, %arg3: memref<2x128xf32, #tpu.memory_space<vmem>>, %arg4: memref<4xf32, #tpu.memory_space<smem>>) attributes {dimension_semantics = [], scalar_prefetch = 0 : i64, scratch_operands = 0 : i64, tpu.core_type = #tpu.core_type<tc>} {
    %c0 = arith.constant 0 : index
    %c0_0 = arith.constant 0 : index
    %0 = vector.load %arg0[%c0, %c0_0] : memref<16x128xf32, #tpu.memory_space<vmem>>, vector<16x128xf32>
    %1 = arith.mulf %0, %0 : vector<16x128xf32>
    %2 = vector.shape_cast %1 : vector<16x128xf32> to vector<1x16x128xf32>
    %cst = arith.constant dense<0.000000e+00> : vector<1xf32>
    %3 = vector.multi_reduction <add>, %2, %cst [1, 2] : vector<1x16x128xf32> to vector<1xf32>
    %4 = vector.shape_cast %3 : vector<1xf32> to vector<1x1x1xf32>
    %5 = vector.extract %4[0, 0, 0] : f32 from vector<1x1x1xf32>
    %c0_1 = arith.constant 0 : index
    %6 = memref.load %arg4[%c0_1] : memref<4xf32, #tpu.memory_space<smem>>
    memref.store %5, %arg4[%c0_1] : memref<4xf32, #tpu.memory_space<smem>>
    %c0_2 = arith.constant 0 : index
    %c0_3 = arith.constant 0 : index
    %7 = vector.load %arg1[%c0_2, %c0_3] : memref<8x128xf32, #tpu.memory_space<vmem>>, vector<8x128xf32>
    %8 = arith.mulf %7, %7 : vector<8x128xf32>
    %9 = vector.shape_cast %8 : vector<8x128xf32> to vector<1x8x128xf32>
    %cst_4 = arith.constant dense<0.000000e+00> : vector<1xf32>
    %10 = vector.multi_reduction <add>, %9, %cst_4 [1, 2] : vector<1x8x128xf32> to vector<1xf32>
    %11 = vector.shape_cast %10 : vector<1xf32> to vector<1x1x1xf32>
    %12 = vector.extract %11[0, 0, 0] : f32 from vector<1x1x1xf32>
    %c1 = arith.constant 1 : index
    %13 = memref.load %arg4[%c1] : memref<4xf32, #tpu.memory_space<smem>>
    memref.store %12, %arg4[%c1] : memref<4xf32, #tpu.memory_space<smem>>
    %c0_5 = arith.constant 0 : index
    %c0_6 = arith.constant 0 : index
    %14 = vector.load %arg2[%c0_5, %c0_6] : memref<4x128xf32, #tpu.memory_space<vmem>>, vector<4x128xf32>
    %15 = arith.mulf %14, %14 : vector<4x128xf32>
    %16 = vector.shape_cast %15 : vector<4x128xf32> to vector<1x4x128xf32>
    %cst_7 = arith.constant dense<0.000000e+00> : vector<1xf32>
    %17 = vector.multi_reduction <add>, %16, %cst_7 [1, 2] : vector<1x4x128xf32> to vector<1xf32>
    %18 = vector.shape_cast %17 : vector<1xf32> to vector<1x1x1xf32>
    %19 = vector.extract %18[0, 0, 0] : f32 from vector<1x1x1xf32>
    %c2 = arith.constant 2 : index
    %20 = memref.load %arg4[%c2] : memref<4xf32, #tpu.memory_space<smem>>
    memref.store %19, %arg4[%c2] : memref<4xf32, #tpu.memory_space<smem>>
    %c0_8 = arith.constant 0 : index
    %c0_9 = arith.constant 0 : index
    %21 = vector.load %arg3[%c0_8, %c0_9] : memref<2x128xf32, #tpu.memory_space<vmem>>, vector<2x128xf32>
    %22 = arith.mulf %21, %21 : vector<2x128xf32>
    %23 = vector.shape_cast %22 : vector<2x128xf32> to vector<1x2x128xf32>
    %cst_10 = arith.constant dense<0.000000e+00> : vector<1xf32>
    %24 = vector.multi_reduction <add>, %23, %cst_10 [1, 2] : vector<1x2x128xf32> to vector<1xf32>
    %25 = vector.shape_cast %24 : vector<1xf32> to vector<1x1x1xf32>
    %26 = vector.extract %25[0, 0, 0] : f32 from vector<1x1x1xf32>
    %c3 = arith.constant 3 : index
    %27 = memref.load %arg4[%c3] : memref<4xf32, #tpu.memory_space<smem>>
    memref.store %26, %arg4[%c3] : memref<4xf32, #tpu.memory_space<smem>>
    return
  }
}

</mosaic_0001>

<bundles_post_ra>
// kernel: tpu_custom_call.1
= control target key start
LH: loop header
LB: loop body
LE: loop exit
PB: predicated region body
PF: predicated region fallthrough
CT: control target
= control target key end

     0   :  { %9 = vsyncpa [#allocation3], 0  ;;  %s287_s0 = inlined_call_operand.hbm [shape: f32[16,128], index: 0, kind: input, shape index: {}]   ;;  %s288_s1 = inlined_call_operand.hbm [shape: f32[8,128], index: 1, kind: input, shape index: {}]   ;;  %s289_s2 = inlined_call_operand.hbm [shape: f32[4,128], index: 2, kind: input, shape index: {}]   ;;  %s290_s3 = inlined_call_operand.vmem [shape: f32[2,128], index: 3, kind: input, shape index: {}]   ;;  %s291_s4 = inlined_call_operand.hbm [shape: f32[4], index: 4, kind: output, shape index: {}]  }
   0x1   :  { %10 = vsyncpa [#allocation6], 0  ;;  %s30_s17 = sshll.u32 %s288_s1, 4  ;;  %s31_s17 = int_to_ptr.hbm [resolvable:$true] %s30_s17 }
   0x2   :  { %11 = vsyncpa [#allocation4], 0  ;;  %s241_s18 = smov [#allocation5]   ;;  %s16_s22 = sshll.u32 %s287_s0, 4  ;;  %s17_s22 = int_to_ptr.hbm [resolvable:$true] %s16_s22 }
   0x3   :  { %s32_s19 = sshll.u32 %s241_s18, 4  ;;  %s242_s23 = smov [#allocation2]   ;;  %s33_s19 = int_to_ptr.vmem [resolvable:$true] %s32_s19 }
   0x4   :  { %35 = dma.hbm_to_vmem [thread:$0]  %s31_s17, 128, %s33_s19, [#allocation6]  }
   0x5   :  { %s18_s24 = sshll.u32 %s242_s23, 4  ;;  %s243_s25 = smov 128   ;;  %s19_s24 = int_to_ptr.vmem [resolvable:$true] %s18_s24 }
   0x6   :  { %s244_s26 = smov 8   ;;  %s41_s1 = sshll.u32 %s289_s2, 4  ;;  %s42_s1 = int_to_ptr.hbm [resolvable:$true] %s41_s1 }
   0x7   :  { %24 = dma.hbm_to_vmem [thread:$0]  %s17_s22, 256, %s19_s24, [#allocation3], %s243_s25, %s243_s25, %s244_s26  }
   0x8   :  { %s245_s29 = smov [#allocation7]  }
   0x9   :  { %s43_s30 = sshll.u32 %s245_s29, 4  ;;  %s44_s30 = int_to_ptr.vmem [resolvable:$true] %s43_s30 }
   0xa   :  { %46 = dma.hbm_to_vmem [thread:$0]  %s42_s1, 64, %s44_s30, [#allocation6]  }
   0xb   :  { %235 = dma.done.wait [#allocation3], 256  }
   0xc   :  { %236 = vsyncadd [#allocation3], 4294967040 }
   0xd   :  { %237 = dma.done.wait [#allocation6], 192  }
   0xe   :  { %238 = vsyncadd [#allocation6], 4294967104  ;;  %v90_v0 = vld [vmem:[#allocation7] sm:$0xf]  ;;  %vm92_vm0 = vcmask 1043456   ;;  %v61_v1 = vld [vmem:[#allocation2] sm:$0xff] }
   0xf   :  { %v62_v2 = vld [vmem:[#allocation2 + $0x8] sm:$0xff]  ;;  %v91_v3 = vmul.f32 %v90_v0, %v90_v0  ;;  %v63_v4 = vmul.f32 %v61_v1, %v61_v1  ;;  %v105_v6 = vld [vmem:[%s290_s3] sm:$0x3]  ;;  %vm107_vm1 = vcmask 1041408   ;;  %v77_v10 = vld [vmem:[#allocation5] sm:$0xff]  ;;  %s125_s7 = sshll.u32 %s291_s4, 4  ;;  %s126_s7 = int_to_ptr.hbm [resolvable:$true] %s125_s7 }
  0x10   :  { %v64_v5 = vmul.f32 %v62_v2, %v62_v2  ;;  %v106_v9 = vmul.f32 %v105_v6, %v105_v6  ;;  %v78_v12 = vmul.f32 %v77_v10, %v77_v10  ;;  %s246_s11 = smov [#allocation8]  }
  0x11   :  { %v93_v7 = vsel %vm92_vm0, %v91_v3, 0.0 }
  0x12   :  { %v65_v8 = vadd.f32 %v64_v5, %v63_v4  ;;  %94 = vadd.xlane.f32.xlu1 %v93_v7  ;;  %v108_v11 = vsel %vm107_vm1, %v106_v9, 0.0 }
  0x14   :  { %66 = vadd.xlane.f32.xlu0 %v65_v8 }
  0x1a   :  { %109 = vadd.xlane.f32.xlu1 %v108_v11 }
  0x1c   :  { %79 = vadd.xlane.f32.xlu0 %v78_v12 }
  0x85   :  { %v95_v13 = vpop.xlane.xlu1 %94 }
  0x86   :  { %v96_v14 = vrot.slane %v95_v13, 4 }
  0x87   :  { %v67_v15 = vpop.xlane.xlu0 %66 }
  0x88   :  { %v68_v16 = vrot.slane %v67_v15, 4  ;;  %v97_v18 = vadd.f32 %v96_v14, %v95_v13 }
  0x8a   :  { %v69_v17 = vadd.f32 %v68_v16, %v67_v15  ;;  %v98_v22 = vrot.slane %v97_v18, 2 }
  0x8c   :  { %v70_v19 = vrot.slane %v69_v17, 2  ;;  %v99_v31 = vadd.f32 %v98_v22, %v97_v18 }
  0x8d   :  { %v110_v20 = vpop.xlane.xlu1 %109 }
  0x8e   :  { %v71_v21 = vadd.f32 %v70_v19, %v69_v17  ;;  %v111_v23 = vrot.slane %v110_v20, 4  ;;  %v100_v35 = vrot.slane %v99_v31, 1 }
  0x8f   :  { %v80_v24 = vpop.xlane.xlu0 %79 }
  0x90   :  { %v81_v25 = vrot.slane %v80_v24, 4  ;;  %v72_v26 = vrot.slane %v71_v21, 1  ;;  %v112_v27 = vadd.f32 %v111_v23, %v110_v20  ;;  %v101_v40 = vadd.f32 %v100_v35, %v99_v31 }
  0x92   :  { %v82_v28 = vadd.f32 %v81_v25, %v80_v24  ;;  %v73_v29 = vadd.f32 %v72_v26, %v71_v21  ;;  %v113_v30 = vrot.slane %v112_v27, 2 }
  0x94   :  { %v83_v32 = vrot.slane %v82_v28, 2  ;;  %137 = vpush %v73_v29  ;;  %v114_v33 = vadd.f32 %v113_v30, %v112_v27 }
  0x96   :  { %v84_v34 = vadd.f32 %v83_v32, %v82_v28  ;;  %v115_v36 = vrot.slane %v114_v33, 1 }
  0x98   :  { %v85_v37 = vrot.slane %v84_v34, 1  ;;  %v116_v39 = vadd.f32 %v115_v36, %v114_v33 }
  0x9a   :  { %v86_v38 = vadd.f32 %v85_v37, %v84_v34 }
  0x9c   :  { %139 = vpush %v86_v38 }
  0x9d   :  { %141 = vpush %v101_v40 }
  0x9e   :  { %143 = vpush %v116_v39 }
  0xc5   :  { %s138_s2 = spop %137 }
  0xc6   :  { %76 = sst [smem:[#allocation8]] %s138_s2 }
  0xcd   :  { %s140_s8 = spop %139 }
  0xce   :  { %89 = sst [smem:[#allocation8 + $0x1]] %s140_s8  ;;  %s142_s9 = spop %141 }
  0xcf   :  { %104 = sst [smem:[#allocation8 + $0x2]] %s142_s9  ;;  %s144_s10 = spop %143 }
  0xd0   :  { %119 = sst [smem:[#allocation8 + $0x3]] %s144_s10 }
  0xd1   :  { %128 = dma.smem_to_hbm %s246_s11, 16, %s126_s7, [#allocation4]  }
  0xd2   :  { %239 = dma.done.wait [#allocation4], 16  }
  0xd3   :  { %240 = vsyncadd [#allocation4], 4294967280 }
  0xd4   :  { %133 = sfence }
  0xd5   :  { %134 = vsyncpa [#allocation3], 1 }
  0xd6   :  { %135 = vsyncpa [#allocation6], 1 }
  0xd7   :  { %136 = vsyncpa [#allocation4], 1 }

</bundles_post_ra>
